<compile_context>
chip_gen: v6e
topology: v6e:2x2x1
jax: 0.10.0
libtpu: 0.0.40
codegen_flags: <defaults>
</compile_context>

<pallas_src>
import math

import jax
import jax.numpy as jnp
from jax.experimental import pallas as pl
from jax.experimental.pallas import tpu as pltpu


def _eca_k_size(C, gamma=2, b=1):
    # Mirrors ECAModule._get_k_value
    t = int(abs(math.log(C, 2) + b) / gamma)
    return t if t % 2 else t + 1


def _make_band_matrix(conv_w, C, P):
    # band[c_out, c_in] = w[j] for c_in = c_out + j - pad (zero padding),
    # with the 1/P spatial-mean normalisation folded in host-side.
    k = conv_w.shape[0]
    pad = (k - 1) // 2
    band = jnp.zeros((C, C), jnp.float32)
    for j in range(k):
        band = band + conv_w[j] * jnp.eye(C, k=j - pad, dtype=jnp.float32)
    return band * (1.0 / float(P))


def _pick_batch_block(N, bytes_per_batch, target_bytes=2 << 20, ceiling_bytes=4 << 20):
    """Largest TB dividing N with TB*bytes_per_batch <= ~4 MiB (so the
    double-buffered in+out stays well under the v7x 64 MiB VMEM), aiming for
    ~2 MiB tiles and keeping >= 2 grid steps so v7x can shard over both TCs."""
    max_tb = max(1, ceiling_bytes // bytes_per_batch)
    if N >= 2:
        max_tb = min(max_tb, max(1, N // 2))   # keep the grid >= 2 steps
    max_tb = min(max_tb, N)
    best = 1
    for tb in range(1, max_tb + 1):
        if N % tb == 0:
            best = tb
            if tb * bytes_per_batch >= target_bytes:
                break
    return best


def eca_kernel(x_ref, band_t_ref, o_ref):
    x = x_ref[...].astype(jnp.float32)                       # (TB, C, Ppad) lane-dense
    s = jnp.sum(x, axis=-1)                                  # (TB, C) spatial sum (XLU)
    # banded channel conv (+ folded 1/P mean): one tiny matmul on the idle MXU
    a = jnp.dot(s, band_t_ref[...],
                preferred_element_type=jnp.float32)          # (TB, C)
    attn = jax.nn.sigmoid(a)                                 # (TB, C)      (EUP)
    o_ref[...] = (x * attn[:, :, None]).astype(o_ref.dtype)  # broadcast over lanes (VPU)


def eca_forward(x, conv_w, *, donate_input=False):
    """x: (N, C, H, W); conv_w: (k,) Conv1d(1,1,k,bias=False) taps."""
    N, C, H, W = x.shape
    P = H * W
    Ppad = max(128, ((P + 127) // 128) * 128)                # keep the lane axis dense
    x_flat = x.reshape(N, C, P)                              # free reshape of NCHW
    if Ppad != P:
        x_flat = jnp.pad(x_flat, ((0, 0), (0, 0), (0, Ppad - P)))
    band_t = _make_band_matrix(conv_w, C, P).T               # (C_in, C_out), 1/P folded

    itemsize = jnp.dtype(x.dtype).itemsize
    bytes_per_batch = C * Ppad * itemsize
    TB = _pick_batch_block(N, bytes_per_batch)
    tile_bytes = TB * bytes_per_batch
    band_bytes = C * C * 4
    # double-buffered in + out (~4x tile) + band + slack; capped at 48 MiB for v7x.
    vmem_limit = int(min(48 << 20,
                         max(32 << 20, 4 * tile_bytes + 2 * band_bytes + (2 << 20))))

    out = pl.pallas_call(
        eca_kernel,
        out_shape=jax.ShapeDtypeStruct((N, C, Ppad), x.dtype),
        grid=(N // TB,),
        in_specs=[
            pl.BlockSpec((TB, C, Ppad), lambda b: (b, 0, 0)),   # TB batch elements
            pl.BlockSpec((C, C), lambda b: (0, 0)),             # banded conv matrix
        ],
        out_specs=pl.BlockSpec((TB, C, Ppad), lambda b: (b, 0, 0)),
        compiler_params=pltpu.CompilerParams(
            dimension_semantics=("parallel",),                  # both TCs on v7x
            vmem_limit_bytes=vmem_limit,
        ),
        input_output_aliases=({0: 0} if donate_input else {}),
    )(x_flat, band_t)

    if Ppad != P:
        out = out[:, :, :P]
    return out.reshape(N, C, H, W)


def eca_reference(x, conv_w):
    # Pure-JAX reference of the PyTorch ECAModule forward.
    N, C, H, W = x.shape
    k = conv_w.shape[0]
    pad = (k - 1) // 2
    y = jnp.mean(x, axis=(2, 3))                             # (N, C) global avg pool
    yp = jnp.pad(y, ((0, 0), (pad, pad)))
    conv = sum(conv_w[j] * yp[:, j:j + C] for j in range(k)) # (N, C)
    attn = jax.nn.sigmoid(conv)[:, :, None, None]
    return x * attn


if __name__ == "__main__":
    key = jax.random.PRNGKey(0)
    keys = jax.random.split(key, 6)

    def check(N, C, H, W, kx, kw):
        x = jax.random.normal(kx, (N, C, H, W), jnp.float32)
        k_size = _eca_k_size(C)                              # = 3 for C=32
        conv_w = 0.5 * jax.random.normal(kw, (k_size,), jnp.float32)
        y = eca_forward(x, conv_w)
        jax.block_until_ready(y)
        assert y.shape == (N, C, H, W)
        y_ref = eca_reference(x, conv_w)
        err = float(jnp.max(jnp.abs(y - y_ref)))
        assert jnp.allclose(y, y_ref, rtol=1e-3, atol=1e-3), err

    check(2, 32, 16, 16, keys[0], keys[1])    # baseline module shape (TB=1, grid=2)
    check(16, 32, 16, 16, keys[2], keys[3])   # multi-batch tiles (TB=8, grid=2)
    check(2, 32, 14, 14, keys[4], keys[5])    # P=196 -> padded-to-256 lane path
    print("KERNEL_OK")
</pallas_src>

<mosaic_0001>
module attributes {stable_mosaic.version = 11 : i64} {
  func.func @eca_kernel(%arg0: i32, %arg1: memref<1x32x256xf32, #tpu.memory_space<vmem>>, %arg2: memref<32x32xf32, #tpu.memory_space<vmem>>, %arg3: memref<1x32x256xf32, #tpu.memory_space<vmem>>) attributes {dimension_semantics = [#tpu.dimension_semantics<parallel>], iteration_bounds = array<i64: 2>, scalar_prefetch = 0 : i64, scratch_operands = 0 : i64, tpu.core_type = #tpu.core_type<tc>, window_params = [{transform_indices = @transform_0, window_bounds = array<i64: 1, 32, 256>}, {pipeline_mode = #tpu.pipeline_mode<synchronous>, transform_indices = @transform_1, window_bounds = array<i64: 32, 32>}, {transform_indices = @transform_2, window_bounds = array<i64: 1, 32, 256>}]} {
    %c0 = arith.constant 0 : index
    %c0_0 = arith.constant 0 : index
    %c0_1 = arith.constant 0 : index
    %0 = vector.load %arg1[%c0, %c0_0, %c0_1] : memref<1x32x256xf32, #tpu.memory_space<vmem>>, vector<1x32x256xf32>
    %cst = arith.constant dense<0.000000e+00> : vector<1x32xf32>
    %1 = vector.multi_reduction <add>, %0, %cst [2] : vector<1x32x256xf32> to vector<1x32xf32>
    %c0_2 = arith.constant 0 : index
    %c0_3 = arith.constant 0 : index
    %2 = vector.load %arg2[%c0_2, %c0_3] : memref<32x32xf32, #tpu.memory_space<vmem>>, vector<32x32xf32>
    %cst_4 = arith.constant dense<0.000000e+00> : vector<1x32xf32>
    %3 = tpu.matmul %1, %2, %cst_4 {dimension_numbers = #tpu.dot_dimension_numbers<[1], [0], [0], [1], [0, 0, 1, 1], [], []>} : vector<1x32xf32>, vector<32x32xf32>, vector<1x32xf32> -> vector<1x32xf32>
    %4 = arith.negf %3 : vector<1x32xf32>
    %5 = math.exp %4 : vector<1x32xf32>
    %cst_5 = arith.constant 1.000000e+00 : f32
    %6 = vector.broadcast %cst_5 : f32 to vector<1x32xf32>
    %7 = arith.addf %6, %5 : vector<1x32xf32>
    %8 = arith.divf %6, %7 : vector<1x32xf32>
    %9 = vector.shape_cast %8 : vector<1x32xf32> to vector<1x32x1xf32>
    %10 = vector.broadcast %9 : vector<1x32x1xf32> to vector<1x32x256xf32>
    %11 = arith.mulf %0, %10 : vector<1x32x256xf32>
    %c0_6 = arith.constant 0 : index
    %c0_7 = arith.constant 0 : index
    %c0_8 = arith.constant 0 : index
    %12 = vector.load %arg3[%c0_6, %c0_7, %c0_8] : memref<1x32x256xf32, #tpu.memory_space<vmem>>, vector<1x32x256xf32>
    tpu.vector_store %arg3[%c0_6, %c0_7, %c0_8], %11 {strides = array<i32>} : memref<1x32x256xf32, #tpu.memory_space<vmem>>, vector<1x32x256xf32>,
    return
  }
  func.func @transform_0(%arg0: i32) -> (i32, i32, i32) {
    %c0_i32 = arith.constant 0 : i32
    %c0_i32_0 = arith.constant 0 : i32
    %c0_i32_1 = arith.constant 0 : i32
    return %arg0, %c0_i32, %c0_i32_0 : i32, i32, i32
  }
  func.func @transform_1(%arg0: i32) -> (i32, i32) {
    %c0_i32 = arith.constant 0 : i32
    %c0_i32_0 = arith.constant 0 : i32
    %c0_i32_1 = arith.constant 0 : i32
    return %c0_i32, %c0_i32_0 : i32, i32
  }
  func.func @transform_2(%arg0: i32) -> (i32, i32, i32) {
    %c0_i32 = arith.constant 0 : i32
    %c0_i32_0 = arith.constant 0 : i32
    %c0_i32_1 = arith.constant 0 : i32
    return %arg0, %c0_i32, %c0_i32_0 : i32, i32, i32
  }
}

</mosaic_0001>

<bundles_post_ra>
// kernel: tpu_custom_call.1
= control target key start
LH: loop header
LB: loop body
LE: loop exit
PB: predicated region body
PF: predicated region fallthrough
CT: control target
= control target key end

     0   :  { %7 = vsyncpa [#allocation3], 0  ;;  %s911_s0 = inlined_call_operand.hbm [shape: f32[2,32,256], index: 0, kind: input, shape index: {}]   ;;  %s912_s1 = inlined_call_operand.hbm [shape: f32[32,32], index: 1, kind: input, shape index: {}]   ;;  %s913_s2 = inlined_call_operand.hbm [shape: f32[2,32,256], index: 2, kind: output, shape index: {}]  }
   0x1   :  { %9 = vsyncpa [#allocation3 + $0x1], 0 }
   0x2   :  { %10 = vsyncpa [#allocation6], 0 }
   0x3   :  { %11 = vsyncpa [#allocation4], 0 }
   0x4   :  { %13 = vsyncpa [#allocation4 + $0x1], 0  ;;  %s698_s9 = smov 0   ;;  %s700_s10 = smov 0  }
   0x5   :  { %s702_s11 = smov 0   ;;  %s704_s12 = smov 0  }
   0x6 LB: > { %s719_s13 = sadd.s32 4294967295, %s670_s12   ;;  %s443_s14 = sadd.s32 4294967294, %s670_s12   ;;  %s670_s12 = sphi %s704_s12, %s935_s12   ;;  %s666_s11 = sphi %s702_s11, %s934_s11   ;;  %s662_s10 = sphi %s700_s10, %s933_s10   ;;  %s658_s9 = sphi %s698_s9, %s932_s9  }
   0x7   : > { %p39_p0 = scmp.ne.s32.totalorder %s662_s10, %s658_s9  ;;  %p914_p1 = scmp.eq.s32.totalorder %s719_s13, 0 }
   0x8   : > { %p90_p3 = scmp.eq.s32.totalorder %s443_s14, 1  ;;  %p444_p5 = scmp.ge.s32.totalorder %s670_s12, 1 }
   0x9   : > { %p728_p4 = por %p914_p1, %p39_p0  ;;  %p97_p7 = scmp.lt.s32.totalorder %s670_s12, 3 }
   0xa   : > { %p733_p6 = por %p90_p3, %p39_p0  ;;  %s672_s18 = smov [#allocation5]  }
   0xb   : > { %s918_s15 = scalar_select %p728_p4, 1, 0 }
   0xc   : > { %s919_s16 = scalar_select %p733_p6, 1, 0 }
   0xd   : > { %p738_p8 = pnand %p444_p5, %p97_p7  ;;  %s109_s19 = sshll.u32 %s672_s18, 4  ;;  %s110_s19 = int_to_ptr.vmem [resolvable:$true] %s109_s19 }
   0xe   : > { %s752_s21 = sadd.s32 1, %s670_s12   ;;  %s26_s22 = sadd.s32 1, %s666_s11 }
   0xf   : > { %s920_s17 = scalar_select %p738_p8, 1, 0 }
  0x10   : > { %p487_p9 = pneg %p738_p8  ;;  %s23_s23 = ssub.s32 %s670_s12, %s752_s21 }
  0x11   : > { %s559_s24 = scalar_lea.vmem %s110_s19, 512  ;;  %p567_p5 = scmp.lt.s32.totalorder %s110_s19, %s110_s19 }
  0x12   : > { %p747_p11 = pnand %p487_p9, %p914_p1  ;;  %p560_p13 = scmp.ne.s32.totalorder %s110_s19, %s559_s24 }
  0x13   : > { %p568_p7 = scmp.lt.s32.totalorder %s559_s24, %s559_s24 }
  0x14   : > { %p550_p12 = pneg %p747_p11 }
  0x15   : > { %p569_p10 = por %p568_p7, %p567_p5 }
  0x16   : > { %p562_p0 = pnand %p560_p13, %p550_p12 }
  0x18   : > { %p563_p3 = pneg %p562_p0 }
  0x1a   : > { %p570_p2 = pnand %p569_p10, %p563_p3 }
  0x1c   : > { %573 = shalt.err (!%p570_p2)
}
  0x1d   : > { %s673_s25 = smov 128   ;;  %s674_s26 = smov 8  }
  0x1e   : > { %490 = dma.hbm_to_vmem [thread:$0]  (!%p747_p11), %s912_s1, 512, %s110_s19, [#allocation6], %s673_s25, %s673_s25, %s674_s26  }
  0x1f   : > { %p24_p9 = scmp.eq.s32.totalorder %s23_s23, 0  ;;  %p33_p12 = scmp.ne.s32.totalorder %s666_s11, %s662_s10 }
  0x20   : > { %p34_p10 = scmp.eq.s32.totalorder %s670_s12, 0  ;;  %p500_p2 = scmp.lt.s32.totalorder %s670_s12, 2 }
  0x21   : > { %s769_s29 = scalar_select %p24_p9, %s666_s11, %s26_s22  }
  0x22   : > { %p35_p13 = por %p34_p10, %p33_p12  ;;  %p922_p0 = scmp.eq.s32.totalorder %s719_s13, 1 }
  0x23   : > { %s123_s3 = sand.u32 1, %s666_s11   ;;  %s461_s4 = sshll.u32 %s670_s12, 10 }
  0x24   : > { %p773_p3 = por %p922_p0, %p33_p12  ;;  %s447_s5 = sshll.u32 %s123_s3, 6 }
  0x25   : > { %s782_s8 = scalar_lea.hbm %s911_s0, %s461_s4  ;;  %s127_s14 = scalar_lea.vmem [#allocation2], %s447_s5 }
  0x26   : > { %s923_s30 = scalar_select %p773_p3, 1, 0 }
  0x27   : > { %s134_s18 = sshll.u32 %s127_s14, 4  ;;  %p784_p11 = pnand %p500_p2, %p35_p13  ;;  %s788_s18 = int_to_ptr.vmem [resolvable:$true] %s134_s18 }
  0x28   : > { %s790_s20 = scalar_lea.sflag [#allocation3], %s123_s3  ;;  %s574_s22 = scalar_lea.hbm %s782_s8, 1024 }
  0x29   : > { %p575_p5 = scmp.ne.s32.totalorder %s782_s8, %s574_s22  ;;  %p576_p7 = pneg %p784_p11 }
  0x2a   : > { %s579_s25 = scalar_lea.hbm %s911_s0, 2048  ;;  %p580_p10 = scmp.lt.s32.totalorder %s782_s8, %s911_s0 }
  0x2b   : > { %p577_p9 = pnand %p576_p7, %p575_p5  ;;  %p581_p2 = scmp.lt.s32.totalorder %s579_s25, %s574_s22 }
  0x2d   : > { %p578_p12 = pneg %p577_p9  ;;  %p582_p13 = por %p581_p2, %p580_p10 }
  0x2f   : > { %p583_p0 = pnand %p582_p13, %p578_p12 }
  0x31   : > { %586 = shalt.err (!%p583_p0)
}
  0x32   : > { %s587_s28 = scalar_lea.vmem %s788_s18, 1024  ;;  %s675_s3 = smov [#allocation2]  }
  0x33   : > { %p588_p1 = scmp.ne.s32.totalorder %s788_s18, %s587_s28  ;;  %s592_s4 = sshll.u32 %s675_s3, 4  ;;  %s593_s4 = int_to_ptr.vmem [resolvable:$false] %s592_s4 }
  0x34   : > { %s594_s5 = scalar_lea.vmem %s593_s4, 2048  ;;  %p595_p9 = scmp.lt.s32.totalorder %s788_s18, %s593_s4 }
  0x35   : > { %p590_p6 = pnand %p588_p1, %p576_p7  ;;  %p596_p3 = scmp.lt.s32.totalorder %s594_s5, %s587_s28 }
  0x37   : > { %p591_p5 = pneg %p590_p6  ;;  %p597_p4 = por %p596_p3, %p595_p9 }
  0x39   : > { %p598_p8 = pnand %p597_p4, %p591_p5 }
  0x3b   : > { %601 = shalt.err (!%p598_p8)
}
  0x3c   : > { %s676_s6 = smov 256   ;;  %s677_s7 = smov 16  }
  0x3d   : > { %494 = dma.hbm_to_vmem [thread:$0]  (!%p784_p11), %s782_s8, 1024, %s788_s18, %s790_s20, %s676_s6, %s676_s6, %s677_s7  }
  0x3e   : > { %p925_p1 = scmp.ne.s32.totalorder %s920_s17, 0 }
  0x3f   : > { %s814_s14 = sand.u32 (!%p925_p1), 1, %s662_s10   ;;  %p926_p4 = scmp.ne.s32.totalorder (!%p925_p1), %s918_s15, 0 }
  0x40   : > { %146 = sbr.rel (%p925_p1) target bundleno = 589 (0x24d), region = 28  ;;  %s451_s22 = sshll.u32 (!%p925_p1), %s814_s14, 6 }
  0x41   : > { %s149_s23 = scalar_lea.sflag (!%p925_p1), [#allocation3], %s814_s14  ;;  %s152_s24 = scalar_lea.vmem (!%p925_p1), [#allocation2], %s451_s22 }
  0x45   : > { %645 = dma.done.wait (%p926_p4), %s149_s23, 1024  }
  0x46   : > { %647 = vsyncadd (%p926_p4), %s149_s23, 4294966272  ;;  %p927_p6 = scmp.eq.s32.totalorder %s719_s13, 0 }
  0x48   : > { %649 = dma.done.wait (%p927_p6), [#allocation6], 512   ;;  %p928_p8 = pmov %p927_p6 }
  0x49   : > { %v828_v0 = vld [vmem:[%s152_s24] sm:$0xff]  ;;  %v830_v1 = vld [vmem:[%s152_s24 + $0x8] sm:$0xff]  ;;  %v838_v5 = vld [vmem:[%s152_s24 + $0x10] sm:$0xff]  ;;  %v678_v12 = vmov 0.0   ;;  %vm679_vm0 = vmmov 0   ;;  %v205_v17 = vlaneseq  ;;  %vm216_vm1 = vcmask 130112  }
  0x4a   : > { %651 = vsyncadd (%p928_p8), [#allocation6], 4294966784  ;;  %v832_v2 = vld [vmem:[%s152_s24 + $0x20] sm:$0xff]  ;;  %v185_v3 = vadd.f32 %v830_v1, %v828_v0  ;;  %v836_v4 = vld [vmem:[%s152_s24 + $0x28] sm:$0xff]  ;;  %468 = vmatprep.subr.mxu0 %v678_v12  ;;  %476 = vmatprep.mubr.msk.f32.mxu0 %vm679_vm0, %v678_v12  ;;  %vm223_vm2 = vcmask 195712   ;;  %vm230_vm3 = vcmask 261312  }
  0x4b   : > { %v840_v6 = vld [vmem:[%s152_s24 + $0x18] sm:$0xff]  ;;  %v191_v7 = vadd.f32 %v836_v4, %v832_v2  ;;  %v844_v8 = vld [vmem:[%s152_s24 + $0x30] sm:$0xff]  ;;  %v198_v15 = vld [vmem:[#allocation5 + $0x8] sm:$0xff]  ;;  %v206_v18 = vand.u32 127, %v205_v17  ;;  %v208_v19 = vshrl.u32 %v205_v17, 7  ;;  %vm232_vm4 = vcmask 261120  }
  0x4c   : > { %v846_v9 = vld [vmem:[%s152_s24 + $0x38] sm:$0xff]  ;;  %186 = vadd.xlane.f32.xlu0 %v185_v3  ;;  %v188_v10 = vadd.f32 %v840_v6, %v838_v5  ;;  %v199_v14 = vld [vmem:[#allocation5 + $0x10] sm:$0xff]  ;;  %v197_v16 = vld [vmem:[#allocation5] sm:$0xff]  ;;  %s176_s15 = scalar_lea.vmem [#allocation7], %s451_s22  ;;  %s462_s8 = sshll.u32 %s719_s13, 10 }
  0x4d   : > { %192 = vadd.xlane.f32.xlu1 %v191_v7  ;;  %v194_v11 = vadd.f32 %v846_v9, %v844_v8  ;;  %v200_v13 = vld [vmem:[#allocation5 + $0x18] sm:$0xff]  ;;  %v211_v20 = vadd.s32 4294967288, %v206_v18  ;;  %v218_v21 = vadd.s32 4294967280, %v206_v18  ;;  %v225_v22 = vadd.s32 4294967272, %v206_v18  ;;  %s360_s17 = sshll.u32 %s176_s15, 4  ;;  %s866_s20 = scalar_lea.hbm %s913_s2, %s462_s8  ;;  %s861_s17 = int_to_ptr.vmem [resolvable:$true] %s360_s17 }
  0x4e   : > { %469 = vmatpush3.msra.mxu0 %v200_v13  ;;  %v209_v24 = vsub.s32 %v206_v18, %v208_v19  ;;  %v313_v43 = vsub.s32 0, %v208_v19  ;;  %s347_s13 = scalar_lea.sflag [#allocation4], %s814_s14  ;;  %s602_s25 = scalar_lea.vmem %s861_s17, 1024 }
  0x4f   : > { %470 = vmatprep.subr.mxu0 %v678_v12  ;;  %v214_v26 = vsub.s32 %v211_v20, %v208_v19  ;;  %v221_v27 = vsub.s32 %v218_v21, %v208_v19  ;;  %v228_v28 = vsub.s32 %v225_v22, %v208_v19  ;;  %p603_p3 = scmp.ne.s32.totalorder %s861_s17, %s602_s25  ;;  %p929_p11 = scmp.ne.s32.totalorder %s923_s30, 0 }
  0x50   : > { %189 = vadd.xlane.f32.xlu0 %v188_v10  ;;  %471 = vmatpush3.msra.mxu0 %v199_v14  ;;  %s680_s26 = smov [#allocation7]  }
  0x51   : > { %195 = vadd.xlane.f32.xlu1 %v194_v11  ;;  %472 = vmatprep.subr.mxu0 %v678_v12  ;;  %p604_p7 = pnand %p603_p3, %p929_p11  ;;  %s606_s27 = sshll.u32 %s680_s26, 4  ;;  %s607_s27 = int_to_ptr.vmem [resolvable:$false] %s606_s27 }
  0x52   : > { %473 = vmatpush3.msra.mxu0 %v198_v15  ;;  %s608_s28 = scalar_lea.vmem %s607_s27, 2048  ;;  %p609_p10 = scmp.lt.s32.totalorder %s861_s17, %s607_s27 }
  0x53   : > { %474 = vmatprep.subr.mxu0 %v678_v12  ;;  %p605_p12 = pneg %p604_p7  ;;  %p610_p2 = scmp.lt.s32.totalorder %s608_s28, %s602_s25 }
  0x54   : > { %475 = vmatpush3.msra.mxu0 %v197_v16 }
  0x55   : > { %p611_p13 = por %p610_p2, %p609_p10 }
  0x57   : > { %p612_p0 = pnand %p611_p13, %p605_p12 }
  0xd5   : > { %v187_v23 = vpop.xlane.xlu0 %186 }
  0xd6   : > { %v193_v25 = vpop.xlane.xlu1 %192  ;;  %v210_v30 = vrot.slane %v187_v23, %v209_v24 }
  0xd7   : > { %v222_v33 = vrot.slane %v193_v25, %v221_v27 }
  0xd9   : > { %v190_v29 = vpop.xlane.xlu0 %189 }
  0xda   : > { %v215_v31 = vrot.slane %v190_v29, %v214_v26  ;;  %v196_v32 = vpop.xlane.xlu1 %195 }
  0xdb   : > { %v229_v34 = vrot.slane %v196_v32, %v228_v28 }
  0xdc   : > { %v217_v35 = vsel %vm216_vm1, %v215_v31, %v210_v30 }
  0xdd   : > { %v224_v36 = vsel %vm223_vm2, %v222_v33, %v217_v35 }
  0xde   : > { %v231_v37 = vsel %vm230_vm3, %v229_v34, %v224_v36 }
  0xdf   : > { %477 = vmatmul.mubr.msk.f32.vlgmr.msra.gmra.mxu0 %vm232_vm4, %v231_v37 }
 0x19f   : > { %v301_v38 = vpop.f32.mrf.mxu0 }
 0x1a0   : > { %v455_v39 = vmul.f32 -1.442695, %v301_v38 }
 0x1a1   : > { %v478_v40 = vpop.f32.mrf.mxu0 }
 0x1a2   : > { %544 = vpow2.f32 %v455_v39 }
 0x1af   : > { %v545_v41 = vpop.eup %544 }
 0x1b0   : > { %v308_v42 = vadd.f32 1.0, %v545_v41 }
 0x1b2   : > { %546 = vrcp.f32 %v308_v42 }
 0x1bf   : > { %v547_v44 = vpop.eup %546 }
 0x1c0   : > { %v314_v45 = vrot.slane %v547_v44, %v313_v43 }
 0x1c2   : > { %320 = vbcast.lane.b32.xlu1 %v314_v45, 264  ;;  %316 = vbcast.lane.b32.xlu0 %v314_v45, 256 }
 0x1c6   : > { %324 = vbcast.lane.b32.xlu1 %v314_v45, 272 }
 0x1ca   : > { %328 = vbcast.lane.b32.xlu1 %v314_v45, 280 }
 0x234   : > { %v321_v46 = vpop.permute.xlu1 %320  ;;  %v317_v47 = vpop.permute.xlu0 %316 }
 0x235   : > { %v332_v48 = vmul.f32 %v321_v46, %v838_v5  ;;  %v333_v49 = vmul.f32 %v321_v46, %v840_v6  ;;  %v330_v50 = vmul.f32 %v317_v47, %v828_v0  ;;  %v331_v51 = vmul.f32 %v317_v47, %v830_v1 }
 0x237   : > { %340 = vst [vmem:[%s176_s15 + $0x10] sm:$0xff] %v332_v48  ;;  %341 = vst [vmem:[%s176_s15 + $0x18] sm:$0xff] %v333_v49 }
 0x238   : > { %338 = vst [vmem:[%s176_s15] sm:$0xff] %v330_v50  ;;  %339 = vst [vmem:[%s176_s15 + $0x8] sm:$0xff] %v331_v51  ;;  %v325_v52 = vpop.permute.xlu1 %324 }
 0x239   : > { %v334_v53 = vmul.f32 %v325_v52, %v832_v2  ;;  %v335_v54 = vmul.f32 %v325_v52, %v836_v4 }
 0x23b   : > { %342 = vst [vmem:[%s176_s15 + $0x20] sm:$0xff] %v334_v53  ;;  %343 = vst [vmem:[%s176_s15 + $0x28] sm:$0xff] %v335_v54 }
 0x23c   : > { %v329_v55 = vpop.permute.xlu1 %328 }
 0x23d   : > { %v336_v56 = vmul.f32 %v329_v55, %v844_v8  ;;  %v337_v57 = vmul.f32 %v329_v55, %v846_v9 }
 0x23f   : > { %344 = vst [vmem:[%s176_s15 + $0x30] sm:$0xff] %v336_v56  ;;  %345 = vst [vmem:[%s176_s15 + $0x38] sm:$0xff] %v337_v57 }
 0x240   : > { %615 = shalt.err (!%p612_p0)
}
 0x241   : > { %s616_s3 = scalar_lea.hbm %s866_s20, 1024  ;;  %s620_s6 = scalar_lea.hbm %s913_s2, 2048 }
 0x242   : > { %p617_p5 = scmp.ne.s32.totalorder %s866_s20, %s616_s3  ;;  %p621_p4 = scmp.lt.s32.totalorder %s866_s20, %s913_s2 }
 0x243   : > { %p622_p6 = scmp.lt.s32.totalorder %s620_s6, %s616_s3 }
 0x244   : > { %p618_p9 = pnand %p617_p5, %p929_p11 }
 0x245   : > { %p623_p8 = por %p622_p6, %p621_p4 }
 0x246   : > { %p619_p1 = pneg %p618_p9 }
 0x248   : > { %p624_p3 = pnand %p623_p8, %p619_p1 }
 0x24a   : > { %627 = shalt.err (!%p624_p3)
}
 0x24b   : > { %s681_s23 = smov 256   ;;  %s682_s24 = smov 16  }
 0x24c   : > { %485 = dma.vmem_to_hbm [thread:$0]  (%p929_p11), %s861_s17, 1024, %s866_s20, %s347_s13, %s681_s23, %s681_s23, %s682_s24  }
 0x24d PF: > { %s375_s15 = sand.u32 1, %s658_s9   ;;  %p930_p7 = scmp.ne.s32.totalorder %s919_s16, 0 }
 0x24e   : > { %p931_p12 = scmp.ge.s32.totalorder %s670_s12, 2  ;;  %s376_s8 = scalar_lea.sflag [#allocation4], %s375_s15 }
 0x250   : > { %p496_p10 = pnand %p931_p12, %p930_p7 }
 0x252   : > { %p497_p2 = pneg %p496_p10 }
 0x254   : > { %653 = dma.done.wait (%p497_p2), %s376_s8, 1024  }
 0x255   : > { %655 = vsyncadd (%p497_p2), %s376_s8, 4294966272  ;;  %p16_p13 = scmp.ge.s32.totalorder %s752_s21, 4   ;;  %s932_s9 = smov %s662_s10 }
 0x256   : > { %s933_s10 = smov %s666_s11  ;;  %s934_s11 = smov %s769_s29 }
 0x257   : > { %s935_s12 = smov %s752_s21  ;;  %18 = sbr.rel (!%p16_p13) target bundleno = 6 (0x6), region = 77 }
 0x25c   :  { %381 = vsyncpa [#allocation3], 1 }
 0x25d   :  { %383 = vsyncpa [#allocation3 + $0x1], 1 }
 0x25e   :  { %384 = vsyncpa [#allocation6], 1 }
 0x25f   :  { %385 = vsyncpa [#allocation4], 1 }
 0x260   :  { %387 = vsyncpa [#allocation4 + $0x1], 1 }

</bundles_post_ra>
